<compile_context>
chip_gen: v6e
topology: v6e:2x2x1
jax: 0.10.0
libtpu: 0.0.40
codegen_flags: <defaults>
</compile_context>

<pallas_src>
import functools

import jax
import jax.numpy as jnp
from jax.experimental import pallas as pl
from jax.experimental.pallas import tpu as pltpu


def _uncertainty_kernel(d_ref, w1_ref, b1_ref, w2_ref, b2_ref, w3_ref, b3_ref,
                        o_ref, *, idx_list):
    d = d_ref[...]                         # [S, TILE] f32, pixels on lanes
    tile = d.shape[-1]

    def linear(w_ref, b_ref, rows):
        # rows: list of [1, TILE]; w_ref: [Cout, Cin]; b_ref: [Cout, 1]
        w = w_ref[...]
        co = w.shape[0]
        acc = jnp.broadcast_to(b_ref[...], (co, tile))
        for k, r in enumerate(rows):
            acc = acc + w[:, k:k + 1] * r          # VPU broadcast-MAC
        return acc

    def rows_of(x):
        return [x[k:k + 1, :] for k in range(x.shape[0])]

    def elu(y):                                    # ELU, alpha = 1
        return jnp.where(y > 0.0, y, jnp.exp(jnp.minimum(y, 0.0)) - 1.0)

    # Pairwise squared disparity differences; the (1/maxdisp)^2 normalization
    # is folded into fc1's weights by the wrapper.
    f_rows = [(d[i:i + 1, :] - d[j:j + 1, :]) ** 2 for (i, j) in idx_list]

    h = elu(linear(w1_ref, b1_ref, f_rows))        # [2L, TILE]
    # TODO(synk): nn.Dropout(p=0.2) is identity in eval mode; training-mode
    # stochastic masking is not implemented.
    h = elu(linear(w2_ref, b2_ref, rows_of(h)))    # [L, TILE]
    o_ref[...] = linear(w3_ref, b3_ref, rows_of(h))  # [3, TILE]


# Max lanes per grid step.  f32 traffic per step = 24 B * TILE (in 3 rows +
# out 3 rows), double-buffered, plus kernel temporaries -> a few MiB; well
# under the default scoped-VMEM limit while amortizing per-step overhead.
_MAX_TILE = 32768


def _round_up(x, m):
    return -(-x // m) * m


def uncertainty_decoder(disp_list, params, maxdisp, num_scale=3):
    """disp_list: list of num_scale arrays [B, H, W]. Returns [3, B, H, W]."""
    assert len(disp_list) == num_scale, "Expected disp predictions from each scale"
    idx_list = tuple((i, j) for i in range(num_scale)
                     for j in range(i + 1, num_scale))

    w1, b1, w2, b2, w3, b3 = params
    # Fold the (1/maxdisp)^2 feature normalization into fc1's weights.
    w1e = (w1 / (maxdisp ** 2)).astype(jnp.float32)
    b1c = b1.reshape(-1, 1).astype(jnp.float32)
    w2e = w2.astype(jnp.float32)
    b2c = b2.reshape(-1, 1).astype(jnp.float32)
    w3e = w3.astype(jnp.float32)
    b3c = b3.reshape(-1, 1).astype(jnp.float32)

    B, H, W = disp_list[0].shape
    N = B * H * W
    # [S, B*H*W]: channels on sublanes, all pixels flattened on the lane axis.
    # Only contiguous H*W planes are moved (cheap stack, no strided transpose).
    d = jnp.stack(disp_list, axis=0).reshape(num_scale, N).astype(jnp.float32)

    tile = min(_MAX_TILE, _round_up(N, 128))
    n_pad = _round_up(N, tile)
    if n_pad != N:
        d = jnp.pad(d, ((0, 0), (0, n_pad - N)))

    full = lambda a: pl.BlockSpec(a.shape, lambda t: (0,) * a.ndim)
    kernel = functools.partial(_uncertainty_kernel, idx_list=idx_list)

    out = pl.pallas_call(
        kernel,
        out_shape=jax.ShapeDtypeStruct((3, n_pad), jnp.float32),
        grid_spec=pltpu.PrefetchScalarGridSpec(
            num_scalar_prefetch=0,
            grid=(n_pad // tile,),
            in_specs=[
                pl.BlockSpec((num_scale, tile), lambda t: (0, t)),
                full(w1e), full(b1c), full(w2e), full(b2c), full(w3e), full(b3c),
            ],
            out_specs=pl.BlockSpec((3, tile), lambda t: (0, t)),
        ),
        compiler_params=pltpu.CompilerParams(
            dimension_semantics=("parallel",)),
    )(d, w1e, b1c, w2e, b2c, w3e, b3c)

    # [3, N] -> [3, B, H, W]: contiguous slice + reshape, no transpose needed.
    return out[:, :N].reshape(3, B, H, W)


def uncertainty_decoder_ref(disp_list, params, maxdisp, num_scale=3):
    """Pure-JAX reference mirroring the PyTorch module (eval mode)."""
    w1, b1, w2, b2, w3, b3 = params
    idx_list = [(i, j) for i in range(num_scale) for j in range(i + 1, num_scale)]
    feats = []
    for i, j in idx_list:
        d1 = disp_list[i] / maxdisp
        d2 = disp_list[j] / maxdisp
        feats.append((d1 - d2) ** 2)
    x = jnp.stack(feats, axis=0)                 # [L, B, H, W]
    x = jnp.transpose(x, (1, 2, 3, 0))           # [B, H, W, L]
    h = jax.nn.elu(x @ w1.T + b1)
    h = jax.nn.elu(h @ w2.T + b2)
    o = h @ w3.T + b3                            # [B, H, W, 3]
    return jnp.transpose(o, (3, 0, 1, 2))        # [3, B, H, W]


def init_params(key, num_scale=3):
    """Deterministic Linear-layer init (PyTorch-style uniform bounds)."""
    L = num_scale * (num_scale - 1) // 2
    ks = jax.random.split(key, 6)

    def lin(kw, kb, cin, cout):
        bound = 1.0 / float(cin) ** 0.5
        w = jax.random.uniform(kw, (cout, cin), jnp.float32, -bound, bound)
        b = jax.random.uniform(kb, (cout,), jnp.float32, -bound, bound)
        return w, b

    w1, b1 = lin(ks[0], ks[1], L, 2 * L)
    w2, b2 = lin(ks[2], ks[3], 2 * L, L)
    w3, b3 = lin(ks[4], ks[5], L, 3)
    return (w1, b1, w2, b2, w3, b3)


if __name__ == "__main__":
    key = jax.random.PRNGKey(0)
    num_scale = 3
    maxdisp = 192.0
    B, H, W = 2, 16, 16

    kd, kp = jax.random.split(key)
    dks = jax.random.split(kd, num_scale)
    disp_list = [maxdisp * jax.random.uniform(dks[s], (B, H, W), jnp.float32)
                 for s in range(num_scale)]
    params = init_params(kp, num_scale)

    out = uncertainty_decoder(disp_list, params, maxdisp, num_scale)
    out = jax.block_until_ready(out)

    ref = uncertainty_decoder_ref(disp_list, params, maxdisp, num_scale)
    assert out.shape == (3, B, H, W), out.shape
    err = float(jnp.max(jnp.abs(out - ref)))
    assert jnp.allclose(out, ref, atol=1e-5, rtol=1e-5), err

    print("KERNEL_OK")
</pallas_src>

<mosaic_0001>
module attributes {stable_mosaic.version = 11 : i64} {
  func.func @_uncertainty_kernel(%arg0: i32, %arg1: memref<3x512xf32, #tpu.memory_space<vmem>>, %arg2: memref<6x3xf32, #tpu.memory_space<vmem>>, %arg3: memref<6x1xf32, #tpu.memory_space<vmem>>, %arg4: memref<3x6xf32, #tpu.memory_space<vmem>>, %arg5: memref<3x1xf32, #tpu.memory_space<vmem>>, %arg6: memref<3x3xf32, #tpu.memory_space<vmem>>, %arg7: memref<3x1xf32, #tpu.memory_space<vmem>>, %arg8: memref<3x512xf32, #tpu.memory_space<vmem>>) attributes {dimension_semantics = [#tpu.dimension_semantics<parallel>], iteration_bounds = array<i64: 1>, scalar_prefetch = 0 : i64, scratch_operands = 0 : i64, tpu.core_type = #tpu.core_type<tc>, window_params = [{transform_indices = @transform_0, window_bounds = array<i64: 3, 512>}, {pipeline_mode = #tpu.pipeline_mode<synchronous>, transform_indices = @transform_1, window_bounds = array<i64: 6, 3>}, {pipeline_mode = #tpu.pipeline_mode<synchronous>, transform_indices = @transform_2, window_bounds = array<i64: 6, 1>}, {pipeline_mode = #tpu.pipeline_mode<synchronous>, transform_indices = @transform_3, window_bounds = array<i64: 3, 6>}, {pipeline_mode = #tpu.pipeline_mode<synchronous>, transform_indices = @transform_4, window_bounds = array<i64: 3, 1>}, {pipeline_mode = #tpu.pipeline_mode<synchronous>, transform_indices = @transform_5, window_bounds = array<i64: 3, 3>}, {pipeline_mode = #tpu.pipeline_mode<synchronous>, transform_indices = @transform_6, window_bounds = array<i64: 3, 1>}, {transform_indices = @transform_7, window_bounds = array<i64: 3, 512>}]} {
    %c0 = arith.constant 0 : index
    %c0_0 = arith.constant 0 : index
    %0 = vector.load %arg1[%c0, %c0_0] : memref<3x512xf32, #tpu.memory_space<vmem>>, vector<3x512xf32>
    %1 = vector.extract_strided_slice %0 {offsets = [0, 0], sizes = [1, 512], strides = [1, 1]} : vector<3x512xf32> to vector<1x512xf32>
    %2 = vector.extract_strided_slice %0 {offsets = [1, 0], sizes = [1, 512], strides = [1, 1]} : vector<3x512xf32> to vector<1x512xf32>
    %3 = arith.subf %1, %2 : vector<1x512xf32>
    %4 = arith.mulf %3, %3 : vector<1x512xf32>
    %5 = vector.extract_strided_slice %0 {offsets = [0, 0], sizes = [1, 512], strides = [1, 1]} : vector<3x512xf32> to vector<1x512xf32>
    %6 = vector.extract_strided_slice %0 {offsets = [2, 0], sizes = [1, 512], strides = [1, 1]} : vector<3x512xf32> to vector<1x512xf32>
    %7 = arith.subf %5, %6 : vector<1x512xf32>
    %8 = arith.mulf %7, %7 : vector<1x512xf32>
    %9 = vector.extract_strided_slice %0 {offsets = [1, 0], sizes = [1, 512], strides = [1, 1]} : vector<3x512xf32> to vector<1x512xf32>
    %10 = vector.extract_strided_slice %0 {offsets = [2, 0], sizes = [1, 512], strides = [1, 1]} : vector<3x512xf32> to vector<1x512xf32>
    %11 = arith.subf %9, %10 : vector<1x512xf32>
    %12 = arith.mulf %11, %11 : vector<1x512xf32>
    %c0_1 = arith.constant 0 : index
    %c0_2 = arith.constant 0 : index
    %13 = vector.load %arg2[%c0_1, %c0_2] : memref<6x3xf32, #tpu.memory_space<vmem>>, vector<6x3xf32>
    %c0_3 = arith.constant 0 : index
    %c0_4 = arith.constant 0 : index
    %14 = vector.load %arg3[%c0_3, %c0_4] : memref<6x1xf32, #tpu.memory_space<vmem>>, vector<6x1xf32>
    %15 = vector.shape_cast %14 : vector<6x1xf32> to vector<6x1xf32>
    %16 = vector.broadcast %15 : vector<6x1xf32> to vector<6x512xf32>
    %17 = vector.extract_strided_slice %13 {offsets = [0, 0], sizes = [6, 1], strides = [1, 1]} : vector<6x3xf32> to vector<6x1xf32>
    %18 = vector.broadcast %17 : vector<6x1xf32> to vector<6x512xf32>
    %19 = vector.broadcast %4 : vector<1x512xf32> to vector<6x512xf32>
    %20 = arith.mulf %18, %19 : vector<6x512xf32>
    %21 = arith.addf %16, %20 : vector<6x512xf32>
    %22 = vector.extract_strided_slice %13 {offsets = [0, 1], sizes = [6, 1], strides = [1, 1]} : vector<6x3xf32> to vector<6x1xf32>
    %23 = vector.broadcast %22 : vector<6x1xf32> to vector<6x512xf32>
    %24 = vector.broadcast %8 : vector<1x512xf32> to vector<6x512xf32>
    %25 = arith.mulf %23, %24 : vector<6x512xf32>
    %26 = arith.addf %21, %25 : vector<6x512xf32>
    %27 = vector.extract_strided_slice %13 {offsets = [0, 2], sizes = [6, 1], strides = [1, 1]} : vector<6x3xf32> to vector<6x1xf32>
    %28 = vector.broadcast %27 : vector<6x1xf32> to vector<6x512xf32>
    %29 = vector.broadcast %12 : vector<1x512xf32> to vector<6x512xf32>
    %30 = arith.mulf %28, %29 : vector<6x512xf32>
    %31 = arith.addf %26, %30 : vector<6x512xf32>
    %cst = arith.constant 0.000000e+00 : f32
    %32 = vector.broadcast %cst : f32 to vector<6x512xf32>
    %33 = arith.cmpf ogt, %31, %32 : vector<6x512xf32>
    %cst_5 = arith.constant 0.000000e+00 : f32
    %34 = vector.broadcast %cst_5 : f32 to vector<6x512xf32>
    %35 = arith.minimumf %31, %34 : vector<6x512xf32>
    %36 = math.exp %35 : vector<6x512xf32>
    %cst_6 = arith.constant 1.000000e+00 : f32
    %37 = vector.broadcast %cst_6 : f32 to vector<6x512xf32>
    %38 = arith.subf %36, %37 : vector<6x512xf32>
    %39 = arith.select %33, %31, %38 : vector<6x512xi1>, vector<6x512xf32>
    %40 = vector.extract_strided_slice %39 {offsets = [0, 0], sizes = [1, 512], strides = [1, 1]} : vector<6x512xf32> to vector<1x512xf32>
    %41 = vector.extract_strided_slice %39 {offsets = [1, 0], sizes = [1, 512], strides = [1, 1]} : vector<6x512xf32> to vector<1x512xf32>
    %42 = vector.extract_strided_slice %39 {offsets = [2, 0], sizes = [1, 512], strides = [1, 1]} : vector<6x512xf32> to vector<1x512xf32>
    %43 = vector.extract_strided_slice %39 {offsets = [3, 0], sizes = [1, 512], strides = [1, 1]} : vector<6x512xf32> to vector<1x512xf32>
    %44 = vector.extract_strided_slice %39 {offsets = [4, 0], sizes = [1, 512], strides = [1, 1]} : vector<6x512xf32> to vector<1x512xf32>
    %45 = vector.extract_strided_slice %39 {offsets = [5, 0], sizes = [1, 512], strides = [1, 1]} : vector<6x512xf32> to vector<1x512xf32>
    %c0_7 = arith.constant 0 : index
    %c0_8 = arith.constant 0 : index
    %46 = vector.load %arg4[%c0_7, %c0_8] : memref<3x6xf32, #tpu.memory_space<vmem>>, vector<3x6xf32>
    %c0_9 = arith.constant 0 : index
    %c0_10 = arith.constant 0 : index
    %47 = vector.load %arg5[%c0_9, %c0_10] : memref<3x1xf32, #tpu.memory_space<vmem>>, vector<3x1xf32>
    %48 = vector.shape_cast %47 : vector<3x1xf32> to vector<3x1xf32>
    %49 = vector.broadcast %48 : vector<3x1xf32> to vector<3x512xf32>
    %50 = vector.extract_strided_slice %46 {offsets = [0, 0], sizes = [3, 1], strides = [1, 1]} : vector<3x6xf32> to vector<3x1xf32>
    %51 = vector.broadcast %50 : vector<3x1xf32> to vector<3x512xf32>
    %52 = vector.broadcast %40 : vector<1x512xf32> to vector<3x512xf32>
    %53 = arith.mulf %51, %52 : vector<3x512xf32>
    %54 = arith.addf %49, %53 : vector<3x512xf32>
    %55 = vector.extract_strided_slice %46 {offsets = [0, 1], sizes = [3, 1], strides = [1, 1]} : vector<3x6xf32> to vector<3x1xf32>
    %56 = vector.broadcast %55 : vector<3x1xf32> to vector<3x512xf32>
    %57 = vector.broadcast %41 : vector<1x512xf32> to vector<3x512xf32>
    %58 = arith.mulf %56, %57 : vector<3x512xf32>
    %59 = arith.addf %54, %58 : vector<3x512xf32>
    %60 = vector.extract_strided_slice %46 {offsets = [0, 2], sizes = [3, 1], strides = [1, 1]} : vector<3x6xf32> to vector<3x1xf32>
    %61 = vector.broadcast %60 : vector<3x1xf32> to vector<3x512xf32>
    %62 = vector.broadcast %42 : vector<1x512xf32> to vector<3x512xf32>
    %63 = arith.mulf %61, %62 : vector<3x512xf32>
    %64 = arith.addf %59, %63 : vector<3x512xf32>
    %65 = vector.extract_strided_slice %46 {offsets = [0, 3], sizes = [3, 1], strides = [1, 1]} : vector<3x6xf32> to vector<3x1xf32>
    %66 = vector.broadcast %65 : vector<3x1xf32> to vector<3x512xf32>
    %67 = vector.broadcast %43 : vector<1x512xf32> to vector<3x512xf32>
    %68 = arith.mulf %66, %67 : vector<3x512xf32>
    %69 = arith.addf %64, %68 : vector<3x512xf32>
    %70 = vector.extract_strided_slice %46 {offsets = [0, 4], sizes = [3, 1], strides = [1, 1]} : vector<3x6xf32> to vector<3x1xf32>
    %71 = vector.broadcast %70 : vector<3x1xf32> to vector<3x512xf32>
    %72 = vector.broadcast %44 : vector<1x512xf32> to vector<3x512xf32>
    %73 = arith.mulf %71, %72 : vector<3x512xf32>
    %74 = arith.addf %69, %73 : vector<3x512xf32>
    %75 = vector.extract_strided_slice %46 {offsets = [0, 5], sizes = [3, 1], strides = [1, 1]} : vector<3x6xf32> to vector<3x1xf32>
    %76 = vector.broadcast %75 : vector<3x1xf32> to vector<3x512xf32>
    %77 = vector.broadcast %45 : vector<1x512xf32> to vector<3x512xf32>
    %78 = arith.mulf %76, %77 : vector<3x512xf32>
    %79 = arith.addf %74, %78 : vector<3x512xf32>
    %cst_11 = arith.constant 0.000000e+00 : f32
    %80 = vector.broadcast %cst_11 : f32 to vector<3x512xf32>
    %81 = arith.cmpf ogt, %79, %80 : vector<3x512xf32>
    %cst_12 = arith.constant 0.000000e+00 : f32
    %82 = vector.broadcast %cst_12 : f32 to vector<3x512xf32>
    %83 = arith.minimumf %79, %82 : vector<3x512xf32>
    %84 = math.exp %83 : vector<3x512xf32>
    %cst_13 = arith.constant 1.000000e+00 : f32
    %85 = vector.broadcast %cst_13 : f32 to vector<3x512xf32>
    %86 = arith.subf %84, %85 : vector<3x512xf32>
    %87 = arith.select %81, %79, %86 : vector<3x512xi1>, vector<3x512xf32>
    %88 = vector.extract_strided_slice %87 {offsets = [0, 0], sizes = [1, 512], strides = [1, 1]} : vector<3x512xf32> to vector<1x512xf32>
    %89 = vector.extract_strided_slice %87 {offsets = [1, 0], sizes = [1, 512], strides = [1, 1]} : vector<3x512xf32> to vector<1x512xf32>
    %90 = vector.extract_strided_slice %87 {offsets = [2, 0], sizes = [1, 512], strides = [1, 1]} : vector<3x512xf32> to vector<1x512xf32>
    %c0_14 = arith.constant 0 : index
    %c0_15 = arith.constant 0 : index
    %91 = vector.load %arg6[%c0_14, %c0_15] : memref<3x3xf32, #tpu.memory_space<vmem>>, vector<3x3xf32>
    %c0_16 = arith.constant 0 : index
    %c0_17 = arith.constant 0 : index
    %92 = vector.load %arg7[%c0_16, %c0_17] : memref<3x1xf32, #tpu.memory_space<vmem>>, vector<3x1xf32>
    %93 = vector.shape_cast %92 : vector<3x1xf32> to vector<3x1xf32>
    %94 = vector.broadcast %93 : vector<3x1xf32> to vector<3x512xf32>
    %95 = vector.extract_strided_slice %91 {offsets = [0, 0], sizes = [3, 1], strides = [1, 1]} : vector<3x3xf32> to vector<3x1xf32>
    %96 = vector.broadcast %95 : vector<3x1xf32> to vector<3x512xf32>
    %97 = vector.broadcast %88 : vector<1x512xf32> to vector<3x512xf32>
    %98 = arith.mulf %96, %97 : vector<3x512xf32>
    %99 = arith.addf %94, %98 : vector<3x512xf32>
    %100 = vector.extract_strided_slice %91 {offsets = [0, 1], sizes = [3, 1], strides = [1, 1]} : vector<3x3xf32> to vector<3x1xf32>
    %101 = vector.broadcast %100 : vector<3x1xf32> to vector<3x512xf32>
    %102 = vector.broadcast %89 : vector<1x512xf32> to vector<3x512xf32>
    %103 = arith.mulf %101, %102 : vector<3x512xf32>
    %104 = arith.addf %99, %103 : vector<3x512xf32>
    %105 = vector.extract_strided_slice %91 {offsets = [0, 2], sizes = [3, 1], strides = [1, 1]} : vector<3x3xf32> to vector<3x1xf32>
    %106 = vector.broadcast %105 : vector<3x1xf32> to vector<3x512xf32>
    %107 = vector.broadcast %90 : vector<1x512xf32> to vector<3x512xf32>
    %108 = arith.mulf %106, %107 : vector<3x512xf32>
    %109 = arith.addf %104, %108 : vector<3x512xf32>
    %c0_18 = arith.constant 0 : index
    %c0_19 = arith.constant 0 : index
    %110 = vector.load %arg8[%c0_18, %c0_19] : memref<3x512xf32, #tpu.memory_space<vmem>>, vector<3x512xf32>
    tpu.vector_store %arg8[%c0_18, %c0_19], %109 {strides = array<i32>} : memref<3x512xf32, #tpu.memory_space<vmem>>, vector<3x512xf32>,
    return
  }
  func.func @transform_0(%arg0: i32) -> (i32, i32) {
    %c0_i32 = arith.constant 0 : i32
    %c0_i32_0 = arith.constant 0 : i32
    return %c0_i32, %arg0 : i32, i32
  }
  func.func @transform_1(%arg0: i32) -> (i32, i32) {
    %c0_i32 = arith.constant 0 : i32
    %c0_i32_0 = arith.constant 0 : i32
    %c0_i32_1 = arith.constant 0 : i32
    return %c0_i32, %c0_i32_0 : i32, i32
  }
  func.func @transform_2(%arg0: i32) -> (i32, i32) {
    %c0_i32 = arith.constant 0 : i32
    %c0_i32_0 = arith.constant 0 : i32
    %c0_i32_1 = arith.constant 0 : i32
    return %c0_i32, %c0_i32_0 : i32, i32
  }
  func.func @transform_3(%arg0: i32) -> (i32, i32) {
    %c0_i32 = arith.constant 0 : i32
    %c0_i32_0 = arith.constant 0 : i32
    %c0_i32_1 = arith.constant 0 : i32
    return %c0_i32, %c0_i32_0 : i32, i32
  }
  func.func @transform_4(%arg0: i32) -> (i32, i32) {
    %c0_i32 = arith.constant 0 : i32
    %c0_i32_0 = arith.constant 0 : i32
    %c0_i32_1 = arith.constant 0 : i32
    return %c0_i32, %c0_i32_0 : i32, i32
  }
  func.func @transform_5(%arg0: i32) -> (i32, i32) {
    %c0_i32 = arith.constant 0 : i32
    %c0_i32_0 = arith.constant 0 : i32
    %c0_i32_1 = arith.constant 0 : i32
    return %c0_i32, %c0_i32_0 : i32, i32
  }
  func.func @transform_6(%arg0: i32) -> (i32, i32) {
    %c0_i32 = arith.constant 0 : i32
    %c0_i32_0 = arith.constant 0 : i32
    %c0_i32_1 = arith.constant 0 : i32
    return %c0_i32, %c0_i32_0 : i32, i32
  }
  func.func @transform_7(%arg0: i32) -> (i32, i32) {
    %c0_i32 = arith.constant 0 : i32
    %c0_i32_0 = arith.constant 0 : i32
    return %c0_i32, %arg0 : i32, i32
  }
}

</mosaic_0001>

<bundles_post_ra>
// kernel: tpu_custom_call.1
= control target key start
LH: loop header
LB: loop body
LE: loop exit
PB: predicated region body
PF: predicated region fallthrough
CT: control target
= control target key end

     0   :  { %v618_v1 = vmov 0   ;;  %v619_v2 = vmov 1   ;;  %s798_s0 = inlined_call_operand.vmem [shape: f32[3,512], index: 0, kind: input, shape index: {}]   ;;  %s799_s1 = inlined_call_operand.vmem [shape: f32[6,3], index: 1, kind: input, shape index: {}]   ;;  %s800_s2 = inlined_call_operand.vmem [shape: f32[6,1], index: 2, kind: input, shape index: {}]   ;;  %s801_s3 = inlined_call_operand.vmem [shape: f32[3,6], index: 3, kind: input, shape index: {}]   ;;  %s802_s4 = inlined_call_operand.vmem [shape: f32[3,1], index: 4, kind: input, shape index: {}]   ;;  %s803_s5 = inlined_call_operand.vmem [shape: f32[3,3], index: 5, kind: input, shape index: {}]   ;;  %s804_s6 = inlined_call_operand.vmem [shape: f32[3,1], index: 6, kind: input, shape index: {}]   ;;  %s805_s7 = inlined_call_operand.hbm [shape: f32[3,512], index: 7, kind: output, shape index: {}]  }
   0x1   :  { %v51_v0 = vld [vmem:[%s799_s1] sm:$0x3f]  ;;  %566 = vset.pattern.permute.xlu0 %v618_v1  ;;  %567 = vset.pattern.permute.xlu1 %v619_v2 }
   0x2   :  { %60 = vperm.xlu0 %566, %v51_v0   ;;  %110 = vperm.xlu1 %567, %v51_v0   ;;  %v52_v3 = vld [vmem:[%s800_s2] sm:$0x3f] }
   0x3   :  { %12 = vsyncpa [#allocation3], 0  ;;  %v620_v4 = vmov 2   ;;  %v231_v5 = vld [vmem:[%s801_s3] sm:$0x7]  ;;  %v621_v7 = vmov 4   ;;  %v65_v14 = vlaneseq }
   0x4   :  { %v232_v6 = vld [vmem:[%s802_s4] sm:$0x7]  ;;  %v622_v8 = vmov 3   ;;  %v623_v10 = vmov 5   ;;  %v28_v13 = vld [vmem:[%s798_s0 + $0x8] sm:$0x77] }
   0x5   :  { %v432_v9 = vld [vmem:[%s804_s6] sm:$0x7]  ;;  %v548_v16 = vrot.slane %v28_v13, 9  ;;  %v550_v18 = vrot.slane %v28_v13, 10  ;;  %v689_v19 = vshrl.u32 %v65_v14, 7 }
   0x6   :  { %55 = vperm.xlu0 %566, %v52_v3   ;;  %568 = vset.pattern.permute.xlu1 %v620_v4  ;;  %v431_v11 = vld [vmem:[%s803_s5] sm:$0x7] }
   0x7   :  { %160 = vperm.xlu1 %568, %v51_v0   ;;  %v27_v12 = vld [vmem:[%s798_s0] sm:$0x77]  ;;  %v38_v21 = vsub.f32 %v28_v13, %v548_v16  ;;  %v48_v23 = vsub.f32 %v28_v13, %v550_v18  ;;  %v692_v24 = vsub.s32 0, %v689_v19  ;;  %v695_v25 = vsub.s32 4, %v689_v19  ;;  %s624_s0 = smov [#allocation2]  }
   0x8   :  { %v547_v15 = vrot.slane %v27_v12, 9  ;;  %v549_v17 = vrot.slane %v27_v12, 10  ;;  %v698_v30 = vsub.s32 1, %v689_v19  ;;  %v701_v31 = vsub.s32 5, %v689_v19  ;;  %s539_s5 = sshll.u32 %s624_s0, 4  ;;  %s540_s5 = int_to_ptr.vmem [resolvable:$true] %s539_s5 }
   0x9   :  { %v40_v27 = vmul.f32 %v38_v21, %v38_v21  ;;  %v50_v29 = vmul.f32 %v48_v23, %v48_v23  ;;  %s596_s12 = scalar_lea.vmem %s540_s5, 256  ;;  %p601_p1 = scmp.lt.s32.totalorder %s540_s5, %s540_s5 }
   0xa   :  { %240 = vperm.xlu0 %566, %v231_v5   ;;  %v37_v20 = vsub.f32 %v27_v12, %v547_v15  ;;  %v47_v22 = vsub.f32 %v27_v12, %v549_v17  ;;  %p597_p0 = scmp.ne.s32.totalorder %s540_s5, %s596_s12  ;;  %p602_p2 = scmp.lt.s32.totalorder %s596_s12, %s596_s12 }
   0xb   :  { %569 = vset.pattern.permute.xlu1 %v618_v1  ;;  %v76_v34 = vrot.slane %v40_v27, %v692_v24  ;;  %v80_v35 = vrot.slane %v40_v27, %v695_v25  ;;  %v126_v38 = vrot.slane %v50_v29, %v692_v24  ;;  %v130_v39 = vrot.slane %v50_v29, %v695_v25 }
   0xc   :  { %235 = vperm.xlu1 %569, %v232_v6   ;;  %v39_v26 = vmul.f32 %v37_v20, %v37_v20  ;;  %v49_v28 = vmul.f32 %v47_v22, %v47_v22  ;;  %v174_v42 = vrot.slane %v40_v27, %v698_v30  ;;  %v178_v43 = vrot.slane %v40_v27, %v701_v31  ;;  %p603_p3 = por %p602_p2, %p601_p1 }
   0xd   :  { %v96_v46 = vrot.slane %v76_v34, %v692_v24  ;;  %v100_v47 = vrot.slane %v80_v35, %v692_v24  ;;  %v146_v52 = vrot.slane %v126_v38, %v692_v24  ;;  %v150_v53 = vrot.slane %v130_v39, %v692_v24 }
   0xe   :  { %570 = vset.pattern.permute.xlu0 %v619_v2  ;;  %v68_v32 = vrot.slane %v39_v26, %v692_v24  ;;  %v72_v33 = vrot.slane %v39_v26, %v695_v25  ;;  %v118_v36 = vrot.slane %v49_v28, %v692_v24  ;;  %v122_v37 = vrot.slane %v49_v28, %v695_v25  ;;  %p604_p4 = pnand %p603_p3, %p597_p0 }
   0xf   :  { %268 = vperm.xlu0 %570, %v231_v5   ;;  %v166_v40 = vrot.slane %v39_v26, %v698_v30  ;;  %v170_v41 = vrot.slane %v39_v26, %v701_v31  ;;  %v194_v56 = vrot.slane %v174_v42, %v698_v30  ;;  %v198_v57 = vrot.slane %v178_v43, %v698_v30 }
  0x10   :  { %571 = vset.pattern.permute.xlu1 %v620_v4  ;;  %v88_v44 = vrot.slane %v68_v32, %v692_v24  ;;  %v92_v45 = vrot.slane %v72_v33, %v692_v24  ;;  %v138_v50 = vrot.slane %v118_v36, %v692_v24  ;;  %v142_v51 = vrot.slane %v122_v37, %v692_v24 }
  0x11   :  { %296 = vperm.xlu1 %571, %v231_v5   ;;  %v186_v54 = vrot.slane %v166_v40, %v698_v30  ;;  %v190_v55 = vrot.slane %v170_v41, %v698_v30  ;;  %v728_v37 = vsub.s32 2, %v689_v19  ;;  %v329_v40 = vsub.s32 3, %v689_v19 }
  0x13   :  { %573 = vset.pattern.permute.xlu0 %v621_v7 }
  0x14   :  { %352 = vperm.xlu0 %573, %v231_v5  }
  0x15   :  { %572 = vset.pattern.permute.xlu1 %v622_v8 }
  0x16   :  { %324 = vperm.xlu1 %572, %v231_v5  }
  0x18   :  { %576 = vset.pattern.permute.xlu0 %v618_v1 }
  0x19   :  { %435 = vperm.xlu0 %576, %v432_v9  }
  0x1a   :  { %574 = vset.pattern.permute.xlu1 %v623_v10 }
  0x1b   :  { %380 = vperm.xlu1 %574, %v231_v5  }
  0x1d   :  { %579 = vset.pattern.permute.xlu0 %v620_v4 }
  0x1f   :  { %575 = vset.pattern.permute.xlu1 %v618_v1 }
  0x20   :  { %440 = vperm.xlu1 %575, %v431_v11  }
  0x24   :  { %577 = vset.pattern.permute.xlu1 %v619_v2 }
  0x25   :  { %468 = vperm.xlu1 %577, %v431_v11  }
  0x29   :  { %578 = vset.pattern.permute.xlu1 %v620_v4 }
  0x2a   :  { %496 = vperm.xlu1 %578, %v431_v11  }
  0x7d   :  { %v61_v48 = vpop.permute.xlu0 %60  ;;  %v111_v49 = vpop.permute.xlu1 %110 }
  0x7e   :  { %v101_v58 = vmul.f32 %v88_v44, %v61_v48  ;;  %v102_v59 = vmul.f32 %v92_v45, %v61_v48  ;;  %v103_v60 = vmul.f32 %v96_v46, %v61_v48  ;;  %v104_v61 = vmul.f32 %v100_v47, %v61_v48 }
  0x7f   :  { %v151_v62 = vmul.f32 %v138_v50, %v111_v49  ;;  %v152_v63 = vmul.f32 %v142_v51, %v111_v49  ;;  %v153_v0 = vmul.f32 %v146_v52, %v111_v49  ;;  %v154_v1 = vmul.f32 %v150_v53, %v111_v49 }
  0x81   :  { %v56_v2 = vpop.permute.xlu0 %55 }
  0x82   :  { %v105_v3 = vadd.f32 %v101_v58, %v56_v2  ;;  %v106_v4 = vadd.f32 %v102_v59, %v56_v2  ;;  %v107_v5 = vadd.f32 %v103_v60, %v56_v2  ;;  %v108_v6 = vadd.f32 %v104_v61, %v56_v2  ;;  %v161_v7 = vpop.permute.xlu1 %160 }
  0x83   :  { %v199_v8 = vmul.f32 %v186_v54, %v161_v7  ;;  %v200_v9 = vmul.f32 %v190_v55, %v161_v7  ;;  %v201_v10 = vmul.f32 %v194_v56, %v161_v7  ;;  %v202_v11 = vmul.f32 %v198_v57, %v161_v7 }
  0x84   :  { %v155_v12 = vadd.f32 %v151_v62, %v105_v3  ;;  %v156_v13 = vadd.f32 %v152_v63, %v106_v4  ;;  %v157_v14 = vadd.f32 %v153_v0, %v107_v5  ;;  %v158_v15 = vadd.f32 %v154_v1, %v108_v6 }
  0x85   :  { %v241_v48 = vpop.permute.xlu0 %240 }
  0x86   :  { %v203_v16 = vadd.f32 %v199_v8, %v155_v12  ;;  %v204_v17 = vadd.f32 %v200_v9, %v156_v13  ;;  %v205_v18 = vadd.f32 %v201_v10, %v157_v14  ;;  %v206_v20 = vadd.f32 %v202_v11, %v158_v15 }
  0x87   :  { %v236_v34 = vpop.permute.xlu1 %235 }
  0x88   :  { %v211_v21 = vmin.f32 %v203_v16, 0.0  ;;  %v212_v22 = vmin.f32 %v204_v17, 0.0  ;;  %v213_v23 = vmin.f32 %v205_v18, 0.0  ;;  %v214_v26 = vmin.f32 %v206_v20, 0.0 }
  0x89   :  { %vm207_vm0 = vcmp.gt.f32.partialorder %v203_v16, 0.0  ;;  %vm208_vm1 = vcmp.gt.f32.partialorder %v204_v17, 0.0  ;;  %vm209_vm2 = vcmp.gt.f32.partialorder %v205_v18, 0.0  ;;  %vm210_vm3 = vcmp.gt.f32.partialorder %v206_v20, 0.0 }
  0x8a   :  { %v215_v27 = vmul.f32 1.442695, %v211_v21  ;;  %v217_v28 = vmul.f32 1.442695, %v212_v22  ;;  %v219_v29 = vmul.f32 1.442695, %v213_v23  ;;  %v269_v5 = vpop.permute.xlu0 %268 }
  0x8b   :  { %v221_v32 = vmul.f32 1.442695, %v214_v26 }
  0x8c   :  { %580 = vpow2.f32 %v215_v27  ;;  %v297_v54 = vpop.permute.xlu1 %296 }
  0x8d   :  { %582 = vpow2.f32 %v217_v28 }
  0x8e   :  { %584 = vpow2.f32 %v219_v29 }
  0x8f   :  { %586 = vpow2.f32 %v221_v32 }
  0x91   :  { %v325_v12 = vpop.permute.xlu1 %324 }
  0x99   :  { %v581_v33 = vpop.eup %580 }
  0x9a   :  { %v583_v35 = vpop.eup %582  ;;  %v551_v36 = vadd.f32 -1.0, %v581_v33 }
  0x9b   :  { %v585_v38 = vpop.eup %584  ;;  %v552_v39 = vadd.f32 -1.0, %v583_v35 }
  0x9c   :  { %v587_v41 = vpop.eup %586  ;;  %v553_v42 = vadd.f32 -1.0, %v585_v38  ;;  %v731_v43 = vsel %vm207_vm0, %v203_v16, %v551_v36  ;;  %v353_v36 = vpop.permute.xlu0 %352 }
  0x9d   :  { %v554_v44 = vadd.f32 -1.0, %v587_v41  ;;  %v733_v45 = vsel %vm208_vm1, %v204_v17, %v552_v39  ;;  %v246_v46 = vrot.slane %v731_v43, %v692_v24  ;;  %v302_v19 = vrot.slane %v731_v43, %v728_v37 }
  0x9e   :  { %v737_v47 = vsel %vm209_vm2, %v205_v18, %v553_v42  ;;  %v250_v49 = vrot.slane %v733_v45, %v692_v24  ;;  %v306_v50 = vrot.slane %v733_v45, %v728_v37  ;;  %v330_v60 = vrot.slane %v731_v43, %v329_v40 }
  0x9f   :  { %v745_v51 = vsel %vm210_vm3, %v206_v20, %v554_v44  ;;  %v254_v52 = vrot.slane %v737_v47, %v692_v24  ;;  %v259_v53 = vmul.f32 %v246_v46, %v241_v48  ;;  %v310_v55 = vrot.slane %v737_v47, %v728_v37  ;;  %v381_v46 = vpop.permute.xlu1 %380 }
  0xa0   :  { %v258_v56 = vrot.slane %v745_v51, %v692_v24  ;;  %v260_v57 = vmul.f32 %v250_v49, %v241_v48  ;;  %v314_v58 = vrot.slane %v745_v51, %v728_v37  ;;  %v315_v63 = vmul.f32 %v302_v19, %v297_v54 }
  0xa1   :  { %v261_v59 = vmul.f32 %v254_v52, %v241_v48  ;;  %v263_v62 = vadd.f32 %v259_v53, %v236_v34  ;;  %v334_v0 = vrot.slane %v733_v45, %v329_v40  ;;  %v316_v1 = vmul.f32 %v306_v50, %v297_v54 }
  0xa2   :  { %v262_v61 = vmul.f32 %v258_v56, %v241_v48  ;;  %v317_v2 = vmul.f32 %v310_v55, %v297_v54  ;;  %v338_v3 = vrot.slane %v737_v47, %v329_v40  ;;  %v342_v4 = vrot.slane %v745_v51, %v329_v40 }
  0xa3   :  { %v264_v6 = vadd.f32 %v260_v57, %v236_v34  ;;  %v318_v7 = vmul.f32 %v314_v58, %v297_v54  ;;  %v274_v8 = vrot.slane %v731_v43, %v698_v30  ;;  %v278_v9 = vrot.slane %v733_v45, %v698_v30 }
  0xa4   :  { %v265_v10 = vadd.f32 %v261_v59, %v236_v34  ;;  %v266_v11 = vadd.f32 %v262_v61, %v236_v34  ;;  %v282_v13 = vrot.slane %v737_v47, %v698_v30  ;;  %v286_v14 = vrot.slane %v745_v51, %v698_v30 }
  0xa5   :  { %v343_v15 = vmul.f32 %v330_v60, %v325_v12  ;;  %v344_v16 = vmul.f32 %v334_v0, %v325_v12  ;;  %v287_v17 = vmul.f32 %v274_v8, %v269_v5  ;;  %v288_v18 = vmul.f32 %v278_v9, %v269_v5  ;;  %v441_v8 = vpop.permute.xlu1 %440 }
  0xa6   :  { %v345_v20 = vmul.f32 %v338_v3, %v325_v12  ;;  %v346_v21 = vmul.f32 %v342_v4, %v325_v12  ;;  %v289_v22 = vmul.f32 %v282_v13, %v269_v5  ;;  %v290_v23 = vmul.f32 %v286_v14, %v269_v5 }
  0xa7   :  { %v291_v26 = vadd.f32 %v287_v17, %v263_v62  ;;  %v292_v27 = vadd.f32 %v288_v18, %v264_v6  ;;  %v386_v28 = vrot.slane %v731_v43, %v701_v31  ;;  %v390_v29 = vrot.slane %v733_v45, %v701_v31 }
  0xa8   :  { %v293_v32 = vadd.f32 %v289_v22, %v265_v10  ;;  %v294_v33 = vadd.f32 %v290_v23, %v266_v11  ;;  %v394_v34 = vrot.slane %v737_v47, %v701_v31  ;;  %v398_v35 = vrot.slane %v745_v51, %v701_v31 }
  0xa9   :  { %v319_v38 = vadd.f32 %v315_v63, %v291_v26  ;;  %v320_v39 = vadd.f32 %v316_v1, %v292_v27  ;;  %v358_v40 = vrot.slane %v731_v43, %v695_v25  ;;  %v362_v41 = vrot.slane %v733_v45, %v695_v25  ;;  %v469_v18 = vpop.permute.xlu1 %468 }
  0xaa   :  { %v321_v42 = vadd.f32 %v317_v2, %v293_v32  ;;  %v322_v44 = vadd.f32 %v318_v7, %v294_v33  ;;  %v366_v48 = vrot.slane %v737_v47, %v695_v25  ;;  %v370_v49 = vrot.slane %v745_v51, %v695_v25  ;;  %v436_v33 = vpop.permute.xlu0 %435 }
  0xab   :  { %v347_v19 = vadd.f32 %v343_v15, %v319_v38  ;;  %v348_v31 = vadd.f32 %v344_v16, %v320_v39  ;;  %v371_v50 = vmul.f32 %v358_v40, %v353_v36  ;;  %v372_v52 = vmul.f32 %v362_v41, %v353_v36 }
  0xac   :  { %v349_v53 = vadd.f32 %v345_v20, %v321_v42  ;;  %v350_v54 = vadd.f32 %v346_v21, %v322_v44  ;;  %v373_v55 = vmul.f32 %v366_v48, %v353_v36  ;;  %v374_v43 = vmul.f32 %v370_v49, %v353_v36 }
  0xad   :  { %v399_v56 = vmul.f32 %v386_v28, %v381_v46  ;;  %v400_v57 = vmul.f32 %v390_v29, %v381_v46  ;;  %v375_v45 = vadd.f32 %v371_v50, %v347_v19  ;;  %v376_v58 = vadd.f32 %v372_v52, %v348_v31  ;;  %v497_v41 = vpop.permute.xlu1 %496 }
  0xae   :  { %v401_v59 = vmul.f32 %v394_v34, %v381_v46  ;;  %v402_v60 = vmul.f32 %v398_v35, %v381_v46  ;;  %v377_v61 = vadd.f32 %v373_v55, %v349_v53  ;;  %v378_v62 = vadd.f32 %v374_v43, %v350_v54 }
  0xaf   :  { %v403_v47 = vadd.f32 %v399_v56, %v375_v45  ;;  %v404_v63 = vadd.f32 %v400_v57, %v376_v58 }
  0xb0   :  { %v405_v0 = vadd.f32 %v401_v59, %v377_v61  ;;  %v406_v25 = vadd.f32 %v402_v60, %v378_v62 }
  0xb1   :  { %v411_v51 = vmin.f32 %v403_v47, 0.0  ;;  %v412_v1 = vmin.f32 %v404_v63, 0.0  ;;  %vm407_vm4 = vcmp.gt.f32.partialorder %v403_v47, 0.0  ;;  %vm408_vm5 = vcmp.gt.f32.partialorder %v404_v63, 0.0 }
  0xb2   :  { %v413_v2 = vmin.f32 %v405_v0, 0.0  ;;  %v414_v3 = vmin.f32 %v406_v25, 0.0  ;;  %vm409_vm6 = vcmp.gt.f32.partialorder %v405_v0, 0.0  ;;  %vm410_vm7 = vcmp.gt.f32.partialorder %v406_v25, 0.0 }
  0xb3   :  { %v415_v4 = vmul.f32 1.442695, %v411_v51  ;;  %v417_v5 = vmul.f32 1.442695, %v412_v1 }
  0xb4   :  { %v419_v6 = vmul.f32 1.442695, %v413_v2  ;;  %v421_v7 = vmul.f32 1.442695, %v414_v3 }
  0xb5   :  { %588 = vpow2.f32 %v415_v4 }
  0xb6   :  { %590 = vpow2.f32 %v417_v5 }
  0xb7   :  { %592 = vpow2.f32 %v419_v6 }
  0xb8   :  { %594 = vpow2.f32 %v421_v7 }
  0xc2   :  { %v589_v9 = vpop.eup %588 }
  0xc3   :  { %v591_v10 = vpop.eup %590  ;;  %v555_v11 = vadd.f32 -1.0, %v589_v9 }
  0xc4   :  { %v593_v12 = vpop.eup %592  ;;  %v556_v13 = vadd.f32 -1.0, %v591_v10 }
  0xc5   :  { %v595_v14 = vpop.eup %594  ;;  %v557_v15 = vadd.f32 -1.0, %v593_v12  ;;  %v427_v16 = vsel %vm407_vm4, %v403_v47, %v555_v11 }
  0xc6   :  { %v558_v17 = vadd.f32 -1.0, %v595_v14  ;;  %v428_v20 = vsel %vm408_vm5, %v404_v63, %v556_v13  ;;  %v446_v23 = vrot.slane %v427_v16, %v692_v24  ;;  %v474_v26 = vrot.slane %v427_v16, %v698_v30 }
  0xc7   :  { %v429_v21 = vsel %vm409_vm6, %v405_v0, %v557_v15  ;;  %v478_v27 = vrot.slane %v428_v20, %v698_v30  ;;  %v450_v28 = vrot.slane %v428_v20, %v692_v24  ;;  %v502_v36 = vrot.slane %v427_v16, %v728_v37 }
  0xc8   :  { %v430_v22 = vsel %vm410_vm7, %v406_v25, %v558_v17  ;;  %v482_v29 = vrot.slane %v429_v21, %v698_v30  ;;  %v454_v34 = vrot.slane %v429_v21, %v692_v24  ;;  %v506_v38 = vrot.slane %v428_v20, %v728_v37 }
  0xc9   :  { %v486_v32 = vrot.slane %v430_v22, %v698_v30  ;;  %v458_v35 = vrot.slane %v430_v22, %v692_v24  ;;  %v459_v39 = vmul.f32 %v446_v23, %v441_v8  ;;  %v460_v40 = vmul.f32 %v450_v28, %v441_v8 }
  0xca   :  { %v510_v42 = vrot.slane %v429_v21, %v728_v37  ;;  %v514_v44 = vrot.slane %v430_v22, %v728_v37  ;;  %v461_v46 = vmul.f32 %v454_v34, %v441_v8  ;;  %v487_v49 = vmul.f32 %v474_v26, %v469_v18 }
  0xcb   :  { %v462_v48 = vmul.f32 %v458_v35, %v441_v8  ;;  %v488_v30 = vmul.f32 %v478_v27, %v469_v18  ;;  %v463_v19 = vadd.f32 %v459_v39, %v436_v33  ;;  %v464_v31 = vadd.f32 %v460_v40, %v436_v33 }
  0xcc   :  { %v489_v50 = vmul.f32 %v482_v29, %v469_v18  ;;  %v490_v52 = vmul.f32 %v486_v32, %v469_v18  ;;  %v465_v24 = vadd.f32 %v461_v46, %v436_v33  ;;  %v515_v54 = vmul.f32 %v502_v36, %v497_v41 }
  0xcd   :  { %v466_v53 = vadd.f32 %v462_v48, %v436_v33  ;;  %v516_v55 = vmul.f32 %v506_v38, %v497_v41  ;;  %v491_v43 = vadd.f32 %v487_v49, %v463_v19  ;;  %v492_v56 = vadd.f32 %v488_v30, %v464_v31 }
  0xce   :  { %v517_v57 = vmul.f32 %v510_v42, %v497_v41  ;;  %v518_v45 = vmul.f32 %v514_v44, %v497_v41  ;;  %v493_v58 = vadd.f32 %v489_v50, %v465_v24 }
  0xcf   :  { %v494_v59 = vadd.f32 %v490_v52, %v466_v53  ;;  %v519_v60 = vadd.f32 %v515_v54, %v491_v43  ;;  %v520_v37 = vadd.f32 %v516_v55, %v492_v56 }
  0xd0   :  { %v521_v61 = vadd.f32 %v517_v57, %v493_v58 }
  0xd1   :  { %v522_v62 = vadd.f32 %v518_v45, %v494_v59  ;;  %v527_v47 = vcombine.low %v519_v60, %v520_v37 }
  0xd3   :  { %v528_v63 = vcombine.low %v521_v61, %v522_v62  ;;  %531 = vst [vmem:[#allocation2] sm:$0x77] %v527_v47 }
  0xd5   :  { %532 = vst [vmem:[#allocation2 + $0x8] sm:$0x77] %v528_v63 }
  0xd6   :  { %607 = shalt.err (!%p604_p4)
}
  0xd7   :  { %542 = dma.vmem_to_hbm [thread:$0]  %s540_s5, 256, %s805_s7, [#allocation3]  }
  0xd8   :  { %616 = dma.done.wait [#allocation3], 256  }
  0xd9   :  { %617 = vsyncadd [#allocation3], 4294967040 }
  0xda   :  { %546 = vsyncpa [#allocation3], 1 }

</bundles_post_ra>
